<compile_context>
chip_gen: v5e
topology: v5e:2x2
jax: 0.10.0
libtpu: 0.0.40
codegen_flags: <defaults>
</compile_context>

<pallas_src>
import functools

import numpy as np
import jax
import jax.numpy as jnp
from jax.experimental import pallas as pl
from jax.experimental.pallas import tpu as pltpu

try:  # fast host solver if present; NumPy fallback keeps the script self-contained
    from scipy.optimize import linear_sum_assignment as _scipy_lsa
except Exception:  # pragma: no cover
    _scipy_lsa = None


def _round_up(x: int, m: int) -> int:
    return (x + m - 1) // m * m


_MAX_TILE_T = 2048                      # column (target/lane) block, multiple of 128
_VMEM_TILE_BUDGET = 10 * 1024 * 1024    # budget for the double-buffered output tile


def _col_tiling(T: int):
    """Return (tc, Tp): lane block and bucketed padded target count."""
    Tp = _round_up(max(T, 1), 128)
    if Tp <= _MAX_TILE_T:
        return Tp, Tp
    Tp = _round_up(Tp, _MAX_TILE_T)
    return _MAX_TILE_T, Tp


def _row_block(N: int, tc: int) -> int:
    """Row block sized so 2 * tn * tc * 4B stays under the VMEM tile budget."""
    tn_cap = max(8, min(1024, (_VMEM_TILE_BUDGET // (2 * 4 * tc)) // 8 * 8))
    return min(tn_cap, _round_up(max(N, 8), 8))


# ---------------------------------------------------------------------------
# Pallas kernels
# ---------------------------------------------------------------------------
def _bbox_giou_cost_kernel(out_ref, tgt_ref, c_ref, *, w_bbox, w_giou):
    """c[i,j] = w_bbox * L1(out_i, tgt_j) - w_giou * GIoU(out_i, tgt_j).

    out_ref: [tn, 4] cxcywh predictions; tgt_ref: [4, tc] cxcywh targets
    (coordinate-major); c_ref: [tn, tc].
    """
    ocx = out_ref[:, 0:1]; ocy = out_ref[:, 1:2]
    ow = out_ref[:, 2:3]; oh = out_ref[:, 3:4]
    tcx = tgt_ref[0:1, :]; tcy = tgt_ref[1:2, :]
    tw = tgt_ref[2:3, :]; th = tgt_ref[3:4, :]

    # box_cxcywh_to_xyxy
    ox0 = ocx - 0.5 * ow; ox1 = ocx + 0.5 * ow
    oy0 = ocy - 0.5 * oh; oy1 = ocy + 0.5 * oh
    tx0 = tcx - 0.5 * tw; tx1 = tcx + 0.5 * tw
    ty0 = tcy - 0.5 * th; ty1 = tcy + 0.5 * th

    # pairwise IoU; per-box areas stay (tn,1)/(1,tc) vectors (no full-tile work)
    iw = jnp.maximum(jnp.minimum(ox1, tx1) - jnp.maximum(ox0, tx0), 0.0)
    ih = jnp.maximum(jnp.minimum(oy1, ty1) - jnp.maximum(oy0, ty0), 0.0)
    inter = iw * ih
    area_o = ow * oh
    area_t = tw * th
    union = jnp.maximum((area_o + area_t) - inter, 1e-9)  # eps: degenerate boxes
    iou = inter / union  # exact divide: keeps assignments stable near ties

    # smallest enclosing box;  giou = iou - (area_c - union)/area_c
    #                               = iou - 1 + union * (1/area_c)
    ew = jnp.maximum(ox1, tx1) - jnp.minimum(ox0, tx0)
    eh = jnp.maximum(oy1, ty1) - jnp.minimum(oy0, ty0)
    area_c = jnp.maximum(ew * eh, 1e-9)
    giou = iou - 1.0 + union * pl.reciprocal(area_c, approx=True)  # EUP slot

    # L1 (cdist p=1) with w_bbox folded into the small coordinate slices:
    # |w*o - w*t| = w*|o - t|; computed last to keep the (tn,tc) live range short.
    if w_bbox != 1.0:
        ocx = ocx * w_bbox; ocy = ocy * w_bbox; ow = ow * w_bbox; oh = oh * w_bbox
        tcx = tcx * w_bbox; tcy = tcy * w_bbox; tw = tw * w_bbox; th = th * w_bbox
    l1 = (jnp.abs(ocx - tcx) + jnp.abs(ocy - tcy)
          + jnp.abs(ow - tw) + jnp.abs(oh - th))

    if w_giou != 1.0:
        c_ref[...] = l1 - w_giou * giou
    else:
        c_ref[...] = l1 - giou


def _l1_cdist_kernel(out_ref, tgt_ref, c_ref, *, dim, w_points):
    """c[i,j] = w_points * sum_d |out[i,d] - tgt[d,j]|  (cdist p=1)."""
    o = out_ref[...]
    t = tgt_ref[...]
    if w_points != 1.0:  # fold the weight into the small [tn,D]/[D,tc] slabs
        o = o * w_points
        t = t * w_points
    acc = jnp.abs(o[:, 0:1] - t[0:1, :])
    for d in range(1, dim):  # small static D -> unrolled VPU adds
        acc = acc + jnp.abs(o[:, d:d + 1] - t[d:d + 1, :])
    c_ref[...] = acc


# ---------------------------------------------------------------------------
# jitted batched wrappers: one pallas_call covers every sample in the batch.
# ---------------------------------------------------------------------------
@functools.partial(jax.jit, static_argnames=("tn", "tc", "w_bbox", "w_giou"))
def _bbox_giou_cost_batched(out_b, tgt_t_b, *, tn, tc, w_bbox, w_giou):
    """out_b: [bs, nq, 4] predictions; tgt_t_b: [bs, 4, Tp] padded, coord-major."""
    bs, nq, _ = out_b.shape
    Tp = tgt_t_b.shape[-1]
    Np = _round_up(max(nq, 8), tn)
    # pad predictions with dummy unit boxes (pad rows are sliced away on host)
    out_p = jnp.zeros((bs, Np, 4), jnp.float32).at[:, :, 2:].set(1.0)
    out_p = out_p.at[:, :nq, :].set(out_b.astype(jnp.float32))

    kernel = functools.partial(_bbox_giou_cost_kernel,
                               w_bbox=float(w_bbox), w_giou=float(w_giou))
    return pl.pallas_call(
        kernel,
        out_shape=jax.ShapeDtypeStruct((bs, Np, Tp), jnp.float32),
        grid=(bs, Np // tn, Tp // tc),
        in_specs=[
            pl.BlockSpec((pl.Squeezed(), tn, 4), lambda b, i, j: (b, i, 0)),
            pl.BlockSpec((pl.Squeezed(), 4, tc), lambda b, i, j: (b, 0, j)),
        ],
        out_specs=pl.BlockSpec((pl.Squeezed(), tn, tc), lambda b, i, j: (b, i, j)),
        compiler_params=pltpu.CompilerParams(
            dimension_semantics=("parallel", "parallel", "parallel"),
            vmem_limit_bytes=32 * 1024 * 1024),
    )(out_p, tgt_t_b)


@functools.partial(jax.jit, static_argnames=("tn", "tc", "w_points"))
def _l1_points_cost_batched(out_b, tgt_t_b, *, tn, tc, w_points):
    """out_b: [bs, nq, D] predictions; tgt_t_b: [bs, D, Tp] padded, coord-major."""
    bs, nq, D = out_b.shape
    Tp = tgt_t_b.shape[-1]
    Np = _round_up(max(nq, 8), tn)
    out_p = jnp.zeros((bs, Np, D), jnp.float32)
    out_p = out_p.at[:, :nq, :].set(out_b.astype(jnp.float32))

    kernel = functools.partial(_l1_cdist_kernel, dim=int(D), w_points=float(w_points))
    return pl.pallas_call(
        kernel,
        out_shape=jax.ShapeDtypeStruct((bs, Np, Tp), jnp.float32),
        grid=(bs, Np // tn, Tp // tc),
        in_specs=[
            pl.BlockSpec((pl.Squeezed(), tn, D), lambda b, i, j: (b, i, 0)),
            pl.BlockSpec((pl.Squeezed(), D, tc), lambda b, i, j: (b, 0, j)),
        ],
        out_specs=pl.BlockSpec((pl.Squeezed(), tn, tc), lambda b, i, j: (b, i, j)),
        compiler_params=pltpu.CompilerParams(
            dimension_semantics=("parallel", "parallel", "parallel"),
            vmem_limit_bytes=32 * 1024 * 1024),
    )(out_p, tgt_t_b)


def _pad_targets(targets, key, D, Tp):
    """Pad ragged [T_b, D] targets into one host array [bs, D, Tp], coord-major."""
    bs = len(targets)
    out = np.zeros((bs, D, Tp), np.float32)
    if D == 4:
        out[:, 2:, :] = 1.0  # dummy unit boxes keep padded GIoU columns finite
    for b, t in enumerate(targets):
        arr = np.asarray(jax.device_get(t[key]), np.float32).reshape(-1, D)
        if arr.shape[0]:
            out[b, :, : arr.shape[0]] = arr.T
    return out


# ---------------------------------------------------------------------------
# Host-side Hungarian assignment
# TODO(synk): linear_sum_assignment is an inherently sequential algorithm with
# no clean Pallas equivalent; it runs on host (scipy if available, else NumPy).
# ---------------------------------------------------------------------------
def _linear_sum_assignment_np(cost):
    cost = np.asarray(cost, dtype=np.float64)
    transposed = False
    if cost.shape[0] > cost.shape[1]:
        cost = cost.T
        transposed = True
    n, m = cost.shape  # n <= m
    INF = float("inf")
    u = [0.0] * (n + 1)
    v = [0.0] * (m + 1)
    p = [0] * (m + 1)      # p[j]: row (1-based) matched to column j, 0 = none
    way = [0] * (m + 1)
    for i in range(1, n + 1):
        p[0] = i
        j0 = 0
        minv = [INF] * (m + 1)
        used = [False] * (m + 1)
        while True:
            used[j0] = True
            i0 = p[j0]
            delta = INF
            j1 = 0
            for j in range(1, m + 1):
                if not used[j]:
                    cur = cost[i0 - 1][j - 1] - u[i0] - v[j]
                    if cur < minv[j]:
                        minv[j] = cur
                        way[j] = j0
                    if minv[j] < delta:
                        delta = minv[j]
                        j1 = j
            for j in range(m + 1):
                if used[j]:
                    u[p[j]] += delta
                    v[j] -= delta
                else:
                    minv[j] -= delta
            j0 = j1
            if p[j0] == 0:
                break
        while True:
            j1 = way[j0]
            p[j0] = p[j1]
            j0 = j1
            if j0 == 0:
                break
    rows, cols = [], []
    for j in range(1, m + 1):
        if p[j] != 0:
            rows.append(p[j] - 1)
            cols.append(j - 1)
    rows = np.asarray(rows, np.int64)
    cols = np.asarray(cols, np.int64)
    if transposed:
        rows, cols = cols, rows
    order = np.argsort(rows)
    return rows[order], cols[order]


def linear_sum_assignment_host(cost):
    cost = np.asarray(cost)
    if _scipy_lsa is not None:
        r, c = _scipy_lsa(cost)
        return np.asarray(r, np.int64), np.asarray(c, np.int64)
    return _linear_sum_assignment_np(cost)


# ---------------------------------------------------------------------------
# HungarianMatcher forward
# ---------------------------------------------------------------------------
class HungarianMatcher:
    def __init__(self, cost_bbox: float = 1, cost_giou: float = 1, cost_points: float = 1):
        assert cost_bbox != 0 or cost_giou != 0, "all costs cant be 0"
        self.cost_bbox = cost_bbox
        self.cost_giou = cost_giou
        self.cost_points = cost_points

    @staticmethod
    def _solve(C, num_queries, sizes):
        # Single device->host transfer for all samples, then per-sample host solves.
        C_np = np.asarray(jax.device_get(C))
        indices = []
        for b, sz in enumerate(sizes):
            if sz == 0:
                indices.append((np.zeros(0, np.int64), np.zeros(0, np.int64)))
                continue
            r, c = linear_sum_assignment_host(C_np[b, :num_queries, :sz])
            indices.append((np.asarray(r, np.int64), np.asarray(c, np.int64)))
        return indices

    def __call__(self, outputs, targets):
        # NOTE: mirrors the reference — only the first key in `outputs` is matched.
        if "pred_block" in outputs or "pred_line1" in outputs:
            for key, value in outputs.items():
                tkey = "block_bbox" if key == "pred_block" else "line1_bbox"
                bs, num_queries = value.shape[:2]
                sizes = [int(np.shape(t[tkey])[0]) for t in targets]
                tc, Tp = _col_tiling(max(sizes) if sizes else 0)
                tn = _row_block(num_queries, tc)
                tgt_np = _pad_targets(targets, tkey, 4, Tp)   # bucketed -> compile once
                preds = jnp.asarray(value).reshape(bs, num_queries, -1)
                C = _bbox_giou_cost_batched(
                    preds, jnp.asarray(tgt_np), tn=tn, tc=tc,
                    w_bbox=float(self.cost_bbox), w_giou=float(self.cost_giou))
                return self._solve(C, num_queries, sizes)
        elif "pred_line2" in outputs:
            for key, value in outputs.items():
                bs, num_queries = value.shape[:2]
                preds = jnp.asarray(value).reshape(bs, num_queries, -1)
                D = int(preds.shape[-1])
                sizes = [int(np.shape(t["line2_bezier"])[0]) for t in targets]
                tc, Tp = _col_tiling(max(sizes) if sizes else 0)
                tn = _row_block(num_queries, tc)
                tgt_np = _pad_targets(targets, "line2_bezier", D, Tp)
                C = _l1_points_cost_batched(
                    preds, jnp.asarray(tgt_np), tn=tn, tc=tc,
                    w_points=float(self.cost_points))
                return self._solve(C, num_queries, sizes)


# ---------------------------------------------------------------------------
# NumPy reference for a sanity check (fp64, exact divides)
# ---------------------------------------------------------------------------
def _ref_bbox_giou_cost(out_bbox, tgt_bbox, w_bbox, w_giou):
    o = np.asarray(out_bbox, np.float64)
    t = np.asarray(tgt_bbox, np.float64)
    l1 = np.abs(o[:, None, :] - t[None, :, :]).sum(-1)

    def to_xyxy(b):
        cx, cy, w, h = b[..., 0], b[..., 1], b[..., 2], b[..., 3]
        return np.stack([cx - 0.5 * w, cy - 0.5 * h, cx + 0.5 * w, cy + 0.5 * h], -1)

    ob = to_xyxy(o)[:, None, :]
    tb = to_xyxy(t)[None, :, :]
    iw = np.clip(np.minimum(ob[..., 2], tb[..., 2]) - np.maximum(ob[..., 0], tb[..., 0]), 0, None)
    ih = np.clip(np.minimum(ob[..., 3], tb[..., 3]) - np.maximum(ob[..., 1], tb[..., 1]), 0, None)
    inter = iw * ih
    ao = (ob[..., 2] - ob[..., 0]) * (ob[..., 3] - ob[..., 1])
    at = (tb[..., 2] - tb[..., 0]) * (tb[..., 3] - tb[..., 1])
    union = ao + at - inter
    iou = inter / union
    ew = np.maximum(ob[..., 2], tb[..., 2]) - np.minimum(ob[..., 0], tb[..., 0])
    eh = np.maximum(ob[..., 3], tb[..., 3]) - np.minimum(ob[..., 1], tb[..., 1])
    ac = ew * eh
    giou = iou - (ac - union) / ac
    return w_bbox * l1 - w_giou * giou


# ---------------------------------------------------------------------------
if __name__ == "__main__":
    key = jax.random.PRNGKey(0)
    bs, nq = 2, 8
    k1, k2, k3, k4, k5, k6 = jax.random.split(key, 6)

    def rand_boxes(k, shape_prefix):
        kcxy, kwh = jax.random.split(k)
        cxy = jax.random.uniform(kcxy, shape_prefix + (2,), minval=0.2, maxval=0.8)
        wh = jax.random.uniform(kwh, shape_prefix + (2,), minval=0.05, maxval=0.3)
        return jnp.concatenate([cxy, wh], axis=-1).astype(jnp.float32)

    pred_block = rand_boxes(k1, (bs, nq))                                 # [2, 8, 4]
    pred_line2 = jax.random.uniform(k6, (bs, nq, 8), dtype=jnp.float32)   # [2, 8, 8]

    targets = [
        {"block_bbox": rand_boxes(k2, (3,)),
         "line2_bezier": jax.random.uniform(k4, (3, 8), dtype=jnp.float32)},
        {"block_bbox": rand_boxes(k3, (5,)),
         "line2_bezier": jax.random.uniform(k5, (5, 8), dtype=jnp.float32)},
    ]
    sizes = [3, 5]

    # --- direct batched kernel run + sanity check against fp64 reference ------
    tc, Tp = _col_tiling(max(sizes))
    tn = _row_block(nq, tc)
    tgt_np = _pad_targets(targets, "block_bbox", 4, Tp)
    C = _bbox_giou_cost_batched(pred_block, jnp.asarray(tgt_np), tn=tn, tc=tc,
                                w_bbox=1.0, w_giou=1.0)
    C = jax.block_until_ready(C)
    C_np = np.asarray(jax.device_get(C))
    for b in range(bs):
        c_ref = _ref_bbox_giou_cost(np.asarray(pred_block[b]),
                                    np.asarray(targets[b]["block_bbox"]), 1.0, 1.0)
        assert np.allclose(C_np[b, :nq, :sizes[b]], c_ref, atol=5e-2), "GIoU cost mismatch"

    tc2, Tp2 = _col_tiling(max(sizes))
    tn2 = _row_block(nq, tc2)
    tgt2_np = _pad_targets(targets, "line2_bezier", 8, Tp2)
    C2 = _l1_points_cost_batched(pred_line2, jnp.asarray(tgt2_np), tn=tn2, tc=tc2,
                                 w_points=1.0)
    C2 = jax.block_until_ready(C2)
    C2_np = np.asarray(jax.device_get(C2))
    for b in range(bs):
        ref2 = np.abs(np.asarray(pred_line2[b], np.float64)[:, None, :]
                      - np.asarray(targets[b]["line2_bezier"], np.float64)[None, :, :]).sum(-1)
        assert np.allclose(C2_np[b, :nq, :sizes[b]], ref2, atol=1e-4), "L1 cdist mismatch"

    matcher = HungarianMatcher(cost_bbox=1.0, cost_giou=1.0, cost_points=1.0)

    # branch 1: L1 bbox + GIoU cost (single batched Pallas launch)
    res_block = matcher({"pred_block": pred_block}, targets)
    for (i, j), sz in zip(res_block, sizes):
        assert len(i) == min(nq, sz) and len(j) == min(nq, sz)
        assert i.dtype == np.int64 and j.dtype == np.int64

    # branch 2: pure L1 cdist on bezier points (single batched Pallas launch)
    res_line2 = matcher({"pred_line2": pred_line2}, targets)
    for (i, j), sz in zip(res_line2, sizes):
        assert len(i) == min(nq, sz) and len(j) == min(nq, sz)
        assert i.dtype == np.int64 and j.dtype == np.int64

    print("KERNEL_OK")
</pallas_src>

<mosaic_0001>
module attributes {stable_mosaic.version = 11 : i64} {
  func.func @_bbox_giou_cost_kernel(%arg0: i32, %arg1: i32, %arg2: i32, %arg3: memref<1x8x4xf32, #tpu.memory_space<vmem>>, %arg4: memref<1x4x128xf32, #tpu.memory_space<vmem>>, %arg5: memref<1x8x128xf32, #tpu.memory_space<vmem>>) attributes {dimension_semantics = [#tpu.dimension_semantics<parallel>, #tpu.dimension_semantics<parallel>, #tpu.dimension_semantics<parallel>], iteration_bounds = array<i64: 2, 1, 1>, scalar_prefetch = 0 : i64, scratch_operands = 0 : i64, tpu.core_type = #tpu.core_type<tc>, window_params = [{transform_indices = @transform_0, window_bounds = array<i64: 1, 8, 4>}, {transform_indices = @transform_1, window_bounds = array<i64: 1, 4, 128>}, {transform_indices = @transform_2, window_bounds = array<i64: 1, 8, 128>}]} {
    %c0 = arith.constant 0 : index
    %c0_0 = arith.constant 0 : index
    %c0_1 = arith.constant 0 : index
    %0 = vector.load %arg3[%c0, %c0_0, %c0_1] : memref<1x8x4xf32, #tpu.memory_space<vmem>>, vector<1x8x1xf32>
    %1 = vector.shape_cast %0 : vector<1x8x1xf32> to vector<8x1xf32>
    %c0_2 = arith.constant 0 : index
    %c0_3 = arith.constant 0 : index
    %c1 = arith.constant 1 : index
    %2 = vector.load %arg3[%c0_2, %c0_3, %c1] : memref<1x8x4xf32, #tpu.memory_space<vmem>>, vector<1x8x1xf32>
    %3 = vector.shape_cast %2 : vector<1x8x1xf32> to vector<8x1xf32>
    %c0_4 = arith.constant 0 : index
    %c0_5 = arith.constant 0 : index
    %c2 = arith.constant 2 : index
    %4 = vector.load %arg3[%c0_4, %c0_5, %c2] : memref<1x8x4xf32, #tpu.memory_space<vmem>>, vector<1x8x1xf32>
    %5 = vector.shape_cast %4 : vector<1x8x1xf32> to vector<8x1xf32>
    %c0_6 = arith.constant 0 : index
    %c0_7 = arith.constant 0 : index
    %c3 = arith.constant 3 : index
    %6 = vector.load %arg3[%c0_6, %c0_7, %c3] : memref<1x8x4xf32, #tpu.memory_space<vmem>>, vector<1x8x1xf32>
    %7 = vector.shape_cast %6 : vector<1x8x1xf32> to vector<8x1xf32>
    %c0_8 = arith.constant 0 : index
    %c0_9 = arith.constant 0 : index
    %c0_10 = arith.constant 0 : index
    %8 = vector.load %arg4[%c0_8, %c0_9, %c0_10] : memref<1x4x128xf32, #tpu.memory_space<vmem>>, vector<1x1x128xf32>
    %9 = vector.shape_cast %8 : vector<1x1x128xf32> to vector<1x128xf32>
    %c0_11 = arith.constant 0 : index
    %c1_12 = arith.constant 1 : index
    %c0_13 = arith.constant 0 : index
    %10 = vector.load %arg4[%c0_11, %c1_12, %c0_13] : memref<1x4x128xf32, #tpu.memory_space<vmem>>, vector<1x1x128xf32>
    %11 = vector.shape_cast %10 : vector<1x1x128xf32> to vector<1x128xf32>
    %c0_14 = arith.constant 0 : index
    %c2_15 = arith.constant 2 : index
    %c0_16 = arith.constant 0 : index
    %12 = vector.load %arg4[%c0_14, %c2_15, %c0_16] : memref<1x4x128xf32, #tpu.memory_space<vmem>>, vector<1x1x128xf32>
    %13 = vector.shape_cast %12 : vector<1x1x128xf32> to vector<1x128xf32>
    %c0_17 = arith.constant 0 : index
    %c3_18 = arith.constant 3 : index
    %c0_19 = arith.constant 0 : index
    %14 = vector.load %arg4[%c0_17, %c3_18, %c0_19] : memref<1x4x128xf32, #tpu.memory_space<vmem>>, vector<1x1x128xf32>
    %15 = vector.shape_cast %14 : vector<1x1x128xf32> to vector<1x128xf32>
    %cst = arith.constant 5.000000e-01 : f32
    %16 = vector.broadcast %cst : f32 to vector<8x1xf32>
    %17 = arith.mulf %16, %5 : vector<8x1xf32>
    %18 = arith.subf %1, %17 : vector<8x1xf32>
    %cst_20 = arith.constant 5.000000e-01 : f32
    %19 = vector.broadcast %cst_20 : f32 to vector<8x1xf32>
    %20 = arith.mulf %19, %5 : vector<8x1xf32>
    %21 = arith.addf %1, %20 : vector<8x1xf32>
    %cst_21 = arith.constant 5.000000e-01 : f32
    %22 = vector.broadcast %cst_21 : f32 to vector<8x1xf32>
    %23 = arith.mulf %22, %7 : vector<8x1xf32>
    %24 = arith.subf %3, %23 : vector<8x1xf32>
    %cst_22 = arith.constant 5.000000e-01 : f32
    %25 = vector.broadcast %cst_22 : f32 to vector<8x1xf32>
    %26 = arith.mulf %25, %7 : vector<8x1xf32>
    %27 = arith.addf %3, %26 : vector<8x1xf32>
    %cst_23 = arith.constant 5.000000e-01 : f32
    %28 = vector.broadcast %cst_23 : f32 to vector<1x128xf32>
    %29 = arith.mulf %28, %13 : vector<1x128xf32>
    %30 = arith.subf %9, %29 : vector<1x128xf32>
    %cst_24 = arith.constant 5.000000e-01 : f32
    %31 = vector.broadcast %cst_24 : f32 to vector<1x128xf32>
    %32 = arith.mulf %31, %13 : vector<1x128xf32>
    %33 = arith.addf %9, %32 : vector<1x128xf32>
    %cst_25 = arith.constant 5.000000e-01 : f32
    %34 = vector.broadcast %cst_25 : f32 to vector<1x128xf32>
    %35 = arith.mulf %34, %15 : vector<1x128xf32>
    %36 = arith.subf %11, %35 : vector<1x128xf32>
    %cst_26 = arith.constant 5.000000e-01 : f32
    %37 = vector.broadcast %cst_26 : f32 to vector<1x128xf32>
    %38 = arith.mulf %37, %15 : vector<1x128xf32>
    %39 = arith.addf %11, %38 : vector<1x128xf32>
    %40 = vector.broadcast %21 : vector<8x1xf32> to vector<8x128xf32>
    %41 = vector.broadcast %33 : vector<1x128xf32> to vector<8x128xf32>
    %42 = arith.minimumf %40, %41 : vector<8x128xf32>
    %43 = vector.broadcast %18 : vector<8x1xf32> to vector<8x128xf32>
    %44 = vector.broadcast %30 : vector<1x128xf32> to vector<8x128xf32>
    %45 = arith.maximumf %43, %44 : vector<8x128xf32>
    %46 = arith.subf %42, %45 : vector<8x128xf32>
    %cst_27 = arith.constant 0.000000e+00 : f32
    %47 = vector.broadcast %cst_27 : f32 to vector<8x128xf32>
    %48 = arith.maximumf %46, %47 : vector<8x128xf32>
    %49 = vector.broadcast %27 : vector<8x1xf32> to vector<8x128xf32>
    %50 = vector.broadcast %39 : vector<1x128xf32> to vector<8x128xf32>
    %51 = arith.minimumf %49, %50 : vector<8x128xf32>
    %52 = vector.broadcast %24 : vector<8x1xf32> to vector<8x128xf32>
    %53 = vector.broadcast %36 : vector<1x128xf32> to vector<8x128xf32>
    %54 = arith.maximumf %52, %53 : vector<8x128xf32>
    %55 = arith.subf %51, %54 : vector<8x128xf32>
    %cst_28 = arith.constant 0.000000e+00 : f32
    %56 = vector.broadcast %cst_28 : f32 to vector<8x128xf32>
    %57 = arith.maximumf %55, %56 : vector<8x128xf32>
    %58 = arith.mulf %48, %57 : vector<8x128xf32>
    %59 = arith.mulf %5, %7 : vector<8x1xf32>
    %60 = arith.mulf %13, %15 : vector<1x128xf32>
    %61 = vector.broadcast %59 : vector<8x1xf32> to vector<8x128xf32>
    %62 = vector.broadcast %60 : vector<1x128xf32> to vector<8x128xf32>
    %63 = arith.addf %61, %62 : vector<8x128xf32>
    %64 = arith.subf %63, %58 : vector<8x128xf32>
    %cst_29 = arith.constant 9.99999971E-10 : f32
    %65 = vector.broadcast %cst_29 : f32 to vector<8x128xf32>
    %66 = arith.maximumf %64, %65 : vector<8x128xf32>
    %67 = arith.divf %58, %66 : vector<8x128xf32>
    %68 = vector.broadcast %21 : vector<8x1xf32> to vector<8x128xf32>
    %69 = vector.broadcast %33 : vector<1x128xf32> to vector<8x128xf32>
    %70 = arith.maximumf %68, %69 : vector<8x128xf32>
    %71 = vector.broadcast %18 : vector<8x1xf32> to vector<8x128xf32>
    %72 = vector.broadcast %30 : vector<1x128xf32> to vector<8x128xf32>
    %73 = arith.minimumf %71, %72 : vector<8x128xf32>
    %74 = arith.subf %70, %73 : vector<8x128xf32>
    %75 = vector.broadcast %27 : vector<8x1xf32> to vector<8x128xf32>
    %76 = vector.broadcast %39 : vector<1x128xf32> to vector<8x128xf32>
    %77 = arith.maximumf %75, %76 : vector<8x128xf32>
    %78 = vector.broadcast %24 : vector<8x1xf32> to vector<8x128xf32>
    %79 = vector.broadcast %36 : vector<1x128xf32> to vector<8x128xf32>
    %80 = arith.minimumf %78, %79 : vector<8x128xf32>
    %81 = arith.subf %77, %80 : vector<8x128xf32>
    %82 = arith.mulf %74, %81 : vector<8x128xf32>
    %cst_30 = arith.constant 9.99999971E-10 : f32
    %83 = vector.broadcast %cst_30 : f32 to vector<8x128xf32>
    %84 = arith.maximumf %82, %83 : vector<8x128xf32>
    %cst_31 = arith.constant 1.000000e+00 : f32
    %85 = vector.broadcast %cst_31 : f32 to vector<8x128xf32>
    %86 = arith.subf %67, %85 : vector<8x128xf32>
    %87 = tpu.reciprocal %84 {approx = true} : vector<8x128xf32> -> vector<8x128xf32>
    %88 = arith.mulf %66, %87 : vector<8x128xf32>
    %89 = arith.addf %86, %88 : vector<8x128xf32>
    %90 = vector.broadcast %1 : vector<8x1xf32> to vector<8x128xf32>
    %91 = vector.broadcast %9 : vector<1x128xf32> to vector<8x128xf32>
    %92 = arith.subf %90, %91 : vector<8x128xf32>
    %93 = math.absf %92 : vector<8x128xf32>
    %94 = vector.broadcast %3 : vector<8x1xf32> to vector<8x128xf32>
    %95 = vector.broadcast %11 : vector<1x128xf32> to vector<8x128xf32>
    %96 = arith.subf %94, %95 : vector<8x128xf32>
    %97 = math.absf %96 : vector<8x128xf32>
    %98 = arith.addf %93, %97 : vector<8x128xf32>
    %99 = vector.broadcast %5 : vector<8x1xf32> to vector<8x128xf32>
    %100 = vector.broadcast %13 : vector<1x128xf32> to vector<8x128xf32>
    %101 = arith.subf %99, %100 : vector<8x128xf32>
    %102 = math.absf %101 : vector<8x128xf32>
    %103 = arith.addf %98, %102 : vector<8x128xf32>
    %104 = vector.broadcast %7 : vector<8x1xf32> to vector<8x128xf32>
    %105 = vector.broadcast %15 : vector<1x128xf32> to vector<8x128xf32>
    %106 = arith.subf %104, %105 : vector<8x128xf32>
    %107 = math.absf %106 : vector<8x128xf32>
    %108 = arith.addf %103, %107 : vector<8x128xf32>
    %109 = arith.subf %108, %89 : vector<8x128xf32>
    %c0_32 = arith.constant 0 : index
    %c0_33 = arith.constant 0 : index
    %c0_34 = arith.constant 0 : index
    %110 = vector.load %arg5[%c0_32, %c0_33, %c0_34] : memref<1x8x128xf32, #tpu.memory_space<vmem>>, vector<1x8x128xf32>
    %111 = vector.shape_cast %110 : vector<1x8x128xf32> to vector<8x128xf32>
    %112 = vector.shape_cast %109 : vector<8x128xf32> to vector<1x8x128xf32>
    tpu.vector_store %arg5[%c0_32, %c0_33, %c0_34], %112 {strides = array<i32>} : memref<1x8x128xf32, #tpu.memory_space<vmem>>, vector<1x8x128xf32>,
    return
  }
  func.func @transform_0(%arg0: i32, %arg1: i32, %arg2: i32) -> (i32, i32, i32) {
    %c0_i32 = arith.constant 0 : i32
    %c0_i32_0 = arith.constant 0 : i32
    return %arg0, %arg1, %c0_i32 : i32, i32, i32
  }
  func.func @transform_1(%arg0: i32, %arg1: i32, %arg2: i32) -> (i32, i32, i32) {
    %c0_i32 = arith.constant 0 : i32
    %c0_i32_0 = arith.constant 0 : i32
    return %arg0, %c0_i32, %arg2 : i32, i32, i32
  }
  func.func @transform_2(%arg0: i32, %arg1: i32, %arg2: i32) -> (i32, i32, i32) {
    %c0_i32 = arith.constant 0 : i32
    return %arg0, %arg1, %arg2 : i32, i32, i32
  }
}

</mosaic_0001>

<bundles_post_ra>
// kernel: _bbox_giou_cost_batched.1
= control target key start
LH: loop header
LB: loop body
LE: loop exit
PB: predicated region body
PF: predicated region fallthrough
CT: control target
= control target key end

     0   :  { %7 = vsyncpa [#allocation3], 0  ;;  %s740_s0 = inlined_call_operand.vmem [shape: f32[2,8,4], index: 0, kind: input, shape index: {}]   ;;  %s741_s1 = inlined_call_operand.vmem [shape: f32[2,4,128], index: 1, kind: input, shape index: {}]   ;;  %s742_s2 = inlined_call_operand.hbm [shape: f32[2,8,128], index: 2, kind: output, shape index: {}]  }
   0x1   :  { %9 = vsyncpa [#allocation3 + $0x1], 0  ;;  %s622_s9 = smov 0   ;;  %s624_s10 = smov 0  }
   0x2   :  { %s626_s11 = smov 0   ;;  %s628_s12 = smov 0  }
   0x3   :  { %s630_s13 = smov 0   ;;  %s632_s14 = smov 0  }
   0x4 LB: > { %s433_s15 = sadd.s32 4294967295, %s599_s14   ;;  %s434_s16 = sadd.s32 4294967294, %s599_s14   ;;  %s599_s14 = sphi %s632_s14, %s15_s14   ;;  %s595_s13 = sphi %s630_s13, %s749_s13   ;;  %s591_s12 = sphi %s628_s12, %s748_s12   ;;  %s587_s11 = sphi %s626_s11, %s747_s11   ;;  %s583_s10 = sphi %s624_s10, %s746_s10   ;;  %s579_s9 = sphi %s622_s9, %s745_s9  }
   0x5   : > { %s34_s17 = sadd.s32 1, %s595_s13  ;;  %s101_s18 = sadd.s32 1, %s587_s11 }
   0x6   : > { %p36_p0 = scmp.ge.s32.totalorder %s34_s17, 2  ;;  %p111_p1 = scmp.ne.s32.totalorder %s587_s11, %s583_s10 }
   0x7   : > { %p112_p2 = scmp.eq.s32.totalorder %s433_s15, 1  ;;  %p117_p3 = scmp.ne.s32.totalorder %s583_s10, %s579_s9 }
   0x8   : > { %s751_s17 = smov (%p36_p0, %s34_s17), 0  ;;  %p118_p5 = scmp.eq.s32.totalorder %s434_s16, 1 }
   0x9   : > { %p662_p4 = por %p112_p2, %p111_p1  ;;  %s94_s20 = ssub.s32 %s595_s13, %s751_s17 }
   0xa   : > { %p437_p6 = scmp.ge.s32.totalorder %s599_s14, 1  ;;  %p99_p7 = scmp.eq.s32.totalorder %s94_s20, 0 }
   0xb   : > { %p669_p8 = por %p118_p5, %p117_p3  ;;  %p156_p9 = scmp.lt.s32.totalorder %s599_s14, 3 }
   0xc   : > { %s675_s22 = scalar_select %p99_p7, %s587_s11, %s101_s18  }
   0xd   : > { %p157_p10 = pnand %p437_p6, %p156_p9 }
   0xe   : > { %p187_p11 = scmp.lt.s32.totalorder (!%p157_p10), %s591_s12, 1  ;;  %s601_s28 = smov (!%p157_p10), 126  }
   0xf   : > { %160 = sbr.rel (%p157_p10) target bundleno = 307 (0x133), region = 28  ;;  %s602_s29 = smov (!%p157_p10), 127  }
  0x10   : > { %s184_s6 = sand.u32 (!%p157_p10), 1, %s583_s10   ;;  %s443_s8 = sshll.u32 (!%p157_p10), %s591_s12, 3 }
  0x11   : > { %s438_s7 = sshll.u32 (!%p157_p10), %s184_s6, 3  ;;  %s338_s18 = scalar_lea.hbm (!%p157_p10), %s742_s2, %s443_s8 }
  0x12   : > { %s186_s20 = scalar_lea.vmem (!%p157_p10), [#allocation2], %s438_s7 }
  0x14   : > { %s679_s23 = scalar_select %p187_p11, %s591_s12, 1  ;;  %v603_v2 = vmov 1   ;;  %v604_v3 = vmov 0   ;;  %v605_v4 = vmov 2   ;;  %v606_v10 = vmov 3  }
  0x15   : > { %508 = vset.pattern.permute.xlu2 %v603_v2  ;;  %507 = vset.pattern.permute.xlu1 %v604_v3  ;;  %s326_s12 = scalar_lea.sflag [#allocation3], %s184_s6 }
  0x16   : > { %s439_s24 = sshll.u32 %s679_s23, 3  ;;  %509 = vset.pattern.permute.xlu0 %v605_v4  ;;  %s440_s30 = sshll.u32 %s679_s23, 2 }
  0x17   : > { %s193_s27 = scalar_lea.vmem %s740_s0, %s439_s24  ;;  %s689_s5 = scalar_lea.vmem %s741_s1, %s440_s30 }
  0x18   : > { %v201_v0 = vld [vmem:[%s193_s27] sm:$0xff]  ;;  %s340_s23 = sshll.u32 %s186_s20, 4  ;;  %s342_s24 = sshll.u32 %s338_s18, 4  ;;  %s341_s23 = int_to_ptr.vmem [resolvable:$true] %s340_s23  ;;  %s343_s24 = int_to_ptr.hbm [resolvable:$true] %s342_s24 }
  0x19   : > { %v206_v1 = vmul.f32 0.5, %v201_v0  ;;  %v205_v11 = vld [vmem:[%s689_s5 + $0x3] sm:$0x1]  ;;  %v204_v13 = vld [vmem:[%s689_s5 + $0x2] sm:$0x1]  ;;  %s535_s25 = sshra.s32 %s343_s24, 4  ;;  %s536_s25 = int_to_ptr.hbm [resolvable:$true] %s535_s25 }
  0x1a   : > { %v216_v14 = vmul.f32 0.5, %v205_v11  ;;  %v203_v15 = vld [vmem:[%s689_s5 + $0x1] sm:$0x1]  ;;  %v213_v17 = vmul.f32 0.5, %v204_v13  ;;  %v202_v18 = vld [vmem:[%s689_s5] sm:$0x1]  ;;  %v255_v29 = vmul.f32 %v205_v11, %v204_v13  ;;  %p542_p1 = scmp.lt.s32.totalorder %s536_s25, %s742_s2 }
  0x1b   : > { %208 = vrot.lane.b32.xlu0 %v206_v1, %s601_s28  ;;  %v514_v53 = vld [vmem:[%s689_s5] ss:$0 sm:$0xff]  ;;  %v513_v54 = vld [vmem:[%s689_s5 + $0x1] ss:$0 sm:$0xff]  ;;  %v515_v55 = vld [vmem:[%s689_s5 + $0x2] ss:$0 sm:$0xff] }
  0x1c   : > { %v217_v16 = vsub.f32 %v203_v15, %v216_v14  ;;  %v218_v19 = vadd.f32 %v216_v14, %v203_v15  ;;  %v215_v22 = vadd.f32 %v213_v17, %v202_v18  ;;  %v214_v23 = vsub.f32 %v202_v18, %v213_v17  ;;  %s537_s26 = scalar_lea.hbm %s536_s25, 8 }
  0x1d   : > { %v261_v35 = vperm.slane %v255_v29, 0  ;;  %p538_p12 = scmp.ne.s32.totalorder %s536_s25, %s537_s26 }
  0x1e   : > { %v245_v21 = vperm.slane %v217_v16, 0  ;;  %v239_v25 = vperm.slane %v218_v19, 0  ;;  %v224_v27 = vperm.slane %v215_v22, 0  ;;  %v231_v28 = vperm.slane %v214_v23, 0 }
  0x1f   : > { %p539_p13 = pnand %p538_p12, %p662_p4 }
  0x21   : > { %p540_p0 = pneg %p539_p13 }
  0x23   : > { %251 = vrot.lane.b32.xlu0 %v201_v0, %s602_s29  ;;  %s541_s29 = scalar_lea.hbm %s742_s2, 16 }
  0x24   : > { %p543_p2 = scmp.lt.s32.totalorder %s541_s29, %s537_s26 }
  0x26   : > { %p544_p3 = por %p543_p2, %p542_p1 }
  0x28   : > { %p545_p5 = pnand %p544_p3, %p540_p0 }
  0x8d   : > { %v209_v5 = vpop.permute.xlu0 %208 }
  0x8e   : > { %v212_v6 = vadd.f32 %v209_v5, %v201_v0  ;;  %v211_v8 = vsub.f32 %v201_v0, %v209_v5 }
  0x90   : > { %236 = vperm.xlu2 %508, %v212_v6   ;;  %221 = vperm.xlu1 %507, %v212_v6  }
  0x95   : > { %v252_v7 = vpop.permute.xlu0 %251 }
  0x96   : > { %v254_v9 = vmul.f32 %v252_v7, %v201_v0 }
  0x98   : > { %242 = vperm.xlu2 %508, %v211_v8   ;;  %228 = vperm.xlu1 %507, %v211_v8  }
  0x99   : > { %258 = vperm.xlu0 %509, %v254_v9  }
  0xa0   : > { %293 = vperm.xlu1 %507, %v201_v0   ;;  %300 = vperm.xlu2 %508, %v201_v0  }
  0xa1   : > { %512 = vset.pattern.permute.xlu0 %v606_v10 }
  0xa8   : > { %510 = vset.pattern.permute.xlu1 %v605_v4  ;;  %511 = vset.pattern.permute.xlu2 %v606_v10 }
  0xa9   : > { %308 = vperm.xlu1 %510, %v201_v0   ;;  %316 = vperm.xlu2 %511, %v201_v0   ;;  %v516_v0 = vld [vmem:[%s689_s5 + $0x3] ss:$0 sm:$0xff] }
  0xea   : > { %v237_v12 = vpop.permute.xlu2 %236 }
  0xeb   : > { %v240_v30 = vmin.f32 %v237_v12, %v239_v25  ;;  %v283_v47 = vmax.f32 %v237_v12, %v239_v25 }
  0xf2   : > { %v243_v24 = vpop.permute.xlu2 %242 }
  0xf3   : > { %v246_v26 = vmax.f32 %v243_v24, %v245_v21  ;;  %v284_v43 = vmin.f32 %v243_v24, %v245_v21 }
  0xf5   : > { %v247_v32 = vsub.f32 %v240_v30, %v246_v26  ;;  %v285_v50 = vsub.f32 %v283_v47, %v284_v43 }
  0xf7   : > { %v248_v38 = vmax.f32 %v247_v32, 0.0 }
  0xfa   : > { %v301_v51 = vpop.permute.xlu2 %300 }
  0xfb   : > { %v304_v61 = vsub.f32 %v301_v51, %v513_v54 }
  0xfd   : > { %v305_v6 = vand.u32 2147483647, %v304_v61 }
 0x102   : > { %v222_v20 = vpop.permute.xlu1 %221 }
 0x103   : > { %v225_v33 = vmin.f32 %v222_v20, %v224_v27  ;;  %v280_v44 = vmax.f32 %v222_v20, %v224_v27  ;;  %v317_v2 = vpop.permute.xlu2 %316 }
 0x104   : > { %v320_v9 = vsub.f32 %v317_v2, %v516_v0 }
 0x106   : > { %v321_v17 = vand.u32 2147483647, %v320_v9 }
 0x10a   : > { %v229_v31 = vpop.permute.xlu1 %228 }
 0x10b   : > { %v232_v34 = vmax.f32 %v229_v31, %v231_v28  ;;  %v259_v36 = vpop.permute.xlu0 %258  ;;  %v281_v41 = vmin.f32 %v229_v31, %v231_v28 }
 0x10c   : > { %v262_v40 = vadd.f32 %v261_v35, %v259_v36 }
 0x10d   : > { %v233_v37 = vsub.f32 %v225_v33, %v232_v34  ;;  %v282_v48 = vsub.f32 %v280_v44, %v281_v41 }
 0x10f   : > { %v234_v39 = vmax.f32 %v233_v37, 0.0  ;;  %v286_v52 = vmul.f32 %v285_v50, %v282_v48 }
 0x111   : > { %v249_v42 = vmul.f32 %v248_v38, %v234_v39  ;;  %v287_v57 = vmax.f32 %v286_v52, 1e-09 }
 0x112   : > { %v294_v46 = vpop.permute.xlu1 %293 }
 0x113   : > { %v263_v45 = vsub.f32 %v262_v40, %v249_v42  ;;  %v297_v60 = vsub.f32 %v294_v46, %v514_v53 }
 0x115   : > { %v264_v49 = vmax.f32 %v263_v45, 1e-09  ;;  %v298_v5 = vand.u32 2147483647, %v297_v60 }
 0x117   : > { %517 = vrcp.f32 %v264_v49  ;;  %v276_v1 = vand.u32 2147483648, %v264_v49  ;;  %v274_v4 = vand.u32 2147483647, %v264_v49  ;;  %vm270_vm1 = vweird.f32 %v264_v49 }
 0x118   : > { %519 = vrcp.f32 %v287_v57  ;;  %v306_v12 = vadd.f32 %v305_v6, %v298_v5 }
 0x119   : > { %v277_v10 = vor.u32 1.1754944e-38, %v276_v1  ;;  %vm275_vm3 = vcmp.eq.f32.partialorder %v274_v4, 8.507059e+37 }
 0x11b   : > { %v309_v58 = vpop.permute.xlu1 %308 }
 0x11c   : > { %v312_v63 = vsub.f32 %v309_v58, %v515_v55 }
 0x11d   : > { %v518_v56 = vpop.eup %517 }
 0x11e   : > { %v266_v59 = vmul.f32 %v518_v56, %v264_v49  ;;  %vm271_vm0 = vweird.f32 %v518_v56  ;;  %v313_v8 = vand.u32 2147483647, %v312_v63  ;;  %v520_v13 = vpop.eup %519 }
 0x11f   : > { %vm272_vm2 = vmor %vm270_vm1, %vm271_vm0  ;;  %v290_v19 = vmul.f32 %v520_v13, %v264_v49 }
 0x120   : > { %v267_v62 = vsub.f32 1.0, %v266_v59  ;;  %v314_v16 = vadd.f32 %v313_v8, %v306_v12 }
 0x122   : > { %v268_v3 = vmul.f32 %v518_v56, %v267_v62  ;;  %v322_v21 = vadd.f32 %v321_v17, %v314_v16 }
 0x124   : > { %v269_v7 = vadd.f32 %v518_v56, %v268_v3 }
 0x126   : > { %v273_v11 = vsel %vm272_vm2, %v518_v56, %v269_v7 }
 0x127   : > { %v278_v14 = vsel %vm275_vm3, %v277_v10, %v273_v11 }
 0x128   : > { %v279_v15 = vmul.f32 %v278_v14, %v249_v42 }
 0x12a   : > { %v441_v18 = vadd.f32 -1.0, %v279_v15 }
 0x12c   : > { %v291_v20 = vadd.f32 %v441_v18, %v290_v19 }
 0x12e   : > { %v323_v22 = vsub.f32 %v322_v21, %v291_v20 }
 0x130   : > { %324 = vst [vmem:[%s186_s20] sm:$0xff] %v323_v22 }
 0x131   : > { %548 = shalt.err (!%p545_p5)
}
 0x132   : > { %446 = dma.vmem_to_hbm [thread:$0]  (%p662_p4), %s341_s23, 128, %s343_s24, %s326_s12  }
 0x133 PF: > { %p452_p6 = scmp.ge.s32.totalorder %s599_s14, 2  ;;  %s354_s4 = sand.u32 1, %s579_s9  }
 0x134   : > { %s355_s5 = scalar_lea.sflag [#allocation3], %s354_s4 }
 0x135   : > { %p449_p7 = pnand %p452_p6, %p669_p8 }
 0x137   : > { %p450_p9 = pneg %p449_p7 }
 0x139   : > { %574 = dma.done.wait (%p450_p9), %s355_s5, 128  }
 0x13a   : > { %576 = vsyncadd (%p450_p9), %s355_s5, 4294967168  ;;  %s15_s14 = sadd.s32 1, %s599_s14   ;;  %s745_s9 = smov %s583_s10 }
 0x13b   : > { %p12_p10 = scmp.ge.s32.totalorder %s15_s14, 4   ;;  %s746_s10 = smov %s587_s11 }
 0x13c   : > { %s747_s11 = smov %s675_s22  ;;  %s748_s12 = smov %s595_s13 }
 0x13d   : > { %s749_s13 = smov %s751_s17  ;;  %14 = sbr.rel (!%p12_p10) target bundleno = 4 (0x4), region = 66 }
 0x142   :  { %361 = vsyncpa [#allocation3], 1 }
 0x143   :  { %363 = vsyncpa [#allocation3 + $0x1], 1 }

</bundles_post_ra>
